<compile_context>
chip_gen: v7x
topology: tpu7x:2x2x1
jax: 0.10.0
libtpu: 0.0.40
codegen_flags: <defaults>
</compile_context>

<pallas_src>
import jax
import jax.numpy as jnp
from jax.experimental import pallas as pl
from jax.experimental.pallas import tpu as pltpu


# ----------------------------- Pallas kernel ---------------------------------
def _round_up(v, m):
    return ((v + m - 1) // m) * m


def _make_fused_kernel(num_layers, out_width, concat_output):
    """Builds a kernel computing all internal aggregation layers + concat in one pass."""

    def kernel(a_ref, x_ref, *rest):
        o_ref = rest[-1]
        wb = rest[:-1]                               # (w_0, b_0, w_1, b_1, ...)
        a = a_ref[...]                               # [Np, Np] bf16 (normalized adjacency)
        x = x_ref[...]                               # [Np, C0] f32  (input node features)
        h = x
        pieces = [x]
        for li in range(num_layers):
            w = wb[2 * li][...]                      # [Ci, Co] bf16
            b = wb[2 * li + 1][...]                  # [1, Co]  f32
            # (h @ W) on the MXU, bf16 operands, f32 accumulation
            hw = jnp.dot(h.astype(jnp.bfloat16), w, preferred_element_type=jnp.float32)
            # A_norm @ (h @ W) on the MXU
            agg = jnp.dot(a, hw.astype(jnp.bfloat16), preferred_element_type=jnp.float32)
            # bias + ReLU on the VPU (ReLU after every layer, incl. the last)
            h = jnp.maximum(agg + b, 0.0)
            pieces.append(h)
        if not concat_output:
            pieces = [h]
        used = sum(p.shape[1] for p in pieces)
        if out_width > used:                         # lane-pad to a 128-multiple slab
            pieces.append(jnp.zeros((a.shape[0], out_width - used), jnp.float32))
        o_ref[...] = jnp.concatenate(pieces, axis=1) if len(pieces) > 1 else pieces[0]

    return kernel


def gripnet_internal_forward(params, x, edge_index, edge_weight=None, concat_output=True):
    """Forward of GripNetInternalModule (num_edge_type == 1 path), fused into one pallas_call."""
    n, c0 = x.shape
    layers = params["layers"]
    num_layers = len(layers)

    # dense normalized adjacency (built once, cast to bf16 once, hoisted out of the kernel call)
    a_norm = build_normalized_adjacency(edge_index, n, edge_weight)

    widths = [c0] + [w.shape[1] for (w, _) in layers]
    c_total = sum(widths) if concat_output else widths[-1]

    n_pad = _round_up(n, 128)                        # MXU M/K fill + lane-aligned A
    out_pad = _round_up(c_total, 128)                # lane-dense output slab

    a_p = jnp.zeros((n_pad, n_pad), jnp.float32).at[:n, :n].set(a_norm).astype(jnp.bfloat16)
    x_p = jnp.zeros((n_pad, c0), jnp.float32).at[:n, :].set(x.astype(jnp.float32))

    in_specs = [
        pl.BlockSpec((n_pad, n_pad), lambda i: (0, 0)),
        pl.BlockSpec((n_pad, c0), lambda i: (0, 0)),
    ]
    wb_inputs = []
    for (w, b) in layers:
        ci, co = w.shape
        wb_inputs.append(w.astype(jnp.bfloat16))
        wb_inputs.append(b.reshape(1, co).astype(jnp.float32))
        in_specs.append(pl.BlockSpec((ci, co), lambda i: (0, 0)))
        in_specs.append(pl.BlockSpec((1, co), lambda i: (0, 0)))

    kernel = _make_fused_kernel(num_layers, out_pad, concat_output)

    out = pl.pallas_call(
        kernel,
        out_shape=jax.ShapeDtypeStruct((n_pad, out_pad), jnp.float32),
        grid=(1,),
        in_specs=in_specs,
        out_specs=pl.BlockSpec((n_pad, out_pad), lambda i: (0, 0)),
        compiler_params=pltpu.CompilerParams(
            dimension_semantics=("arbitrary",),
            vmem_limit_bytes=32 * 1024 * 1024,
        ),
    )(a_p, x_p, *wb_inputs)

    return out[:n, :c_total]


# ----------------------------- plain-JAX glue ---------------------------------
def build_normalized_adjacency(edge_index, num_nodes, edge_weight=None):
    """Dense equivalent of GCNEncoderLayer.norm (add_remaining_self_loops + sym. normalization).

    Matches kale's GCNEncoderLayer: existing self-loop edges are replaced by a single self-loop
    whose weight is the existing one (fill=1 for nodes without a self-loop); duplicate non-loop
    edges accumulate; degree is accumulated at the ROW (source) index, as in the module.
    """
    row, col = edge_index[0], edge_index[1]
    e = row.shape[0]
    if edge_weight is None:
        edge_weight = jnp.ones((e,), dtype=jnp.float32)
    edge_weight = edge_weight.astype(jnp.float32)
    is_loop = row == col

    # off-diagonal edges accumulate (duplicates sum, like the sparse message passing)
    off_w = jnp.where(is_loop, 0.0, edge_weight)
    w_dense = jnp.zeros((num_nodes, num_nodes), jnp.float32).at[row, col].add(off_w)

    # one self-loop per node: existing self-loop weight if present, else fill_value = 1
    loop_w = jnp.ones((num_nodes,), jnp.float32)
    loop_idx = jnp.where(is_loop, row, num_nodes)          # OOB index -> dropped
    loop_w = loop_w.at[loop_idx].set(edge_weight, mode="drop")
    diag = jnp.arange(num_nodes)
    w_dense = w_dense.at[diag, diag].set(loop_w)

    # deg = scatter_add(edge_weight, row)  -> row-sum of the dense weight matrix
    deg = jnp.sum(w_dense, axis=1)
    deg_inv_sqrt = jnp.where(deg > 0, deg ** -0.5, 0.0)
    # aggregation: out[i] = sum_{e: col_e==i} norm_e * x[row_e]
    #   => A_msg[i, j] = dinv[i] * W[j, i] * dinv[j]
    a_norm = deg_inv_sqrt[:, None] * w_dense.T * deg_inv_sqrt[None, :]
    return a_norm


def glorot(key, shape):
    fan_in, fan_out = shape
    limit = (6.0 / (fan_in + fan_out)) ** 0.5
    return jax.random.uniform(key, shape, jnp.float32, -limit, limit)


def init_gripnet_internal_params(key, in_channels, inter_feat_channels, inter_agg_channels_list):
    """Deterministic synthetic parameters matching the module's __init__ shapes."""
    keys = jax.random.split(key, 1 + 2 * len(inter_agg_channels_list))
    params = {}
    # internal feature layer (parameter exists in the module but, per the module's Note,
    # it is applied in the GripNet class forward, not inside this module's forward).
    params["embedding"] = jax.random.normal(keys[0], (in_channels, inter_feat_channels), jnp.float32)
    dims = [inter_feat_channels] + list(inter_agg_channels_list)
    layers = []
    for i in range(len(inter_agg_channels_list)):
        w = glorot(keys[1 + 2 * i], (dims[i], dims[i + 1]))
        b = 0.01 * jax.random.normal(keys[2 + 2 * i], (dims[i + 1],), jnp.float32)
        layers.append((w, b))
    params["layers"] = layers
    return params


# --------------------------- f32 edge-list reference ---------------------------
# Independent of the dense adjacency builder: mirrors the PyTorch module's sparse
# scatter-based message passing (norm + propagate) directly, in float32.
def _edge_list_norm(edge_index, num_nodes, edge_weight=None):
    row, col = edge_index[0], edge_index[1]
    e = row.shape[0]
    if edge_weight is None:
        edge_weight = jnp.ones((e,), jnp.float32)
    edge_weight = edge_weight.astype(jnp.float32)
    is_loop = row == col
    w_edges = jnp.where(is_loop, 0.0, edge_weight)          # drop existing self-loop edges
    loop_w = jnp.ones((num_nodes,), jnp.float32)             # fill_value = 1
    loop_w = loop_w.at[jnp.where(is_loop, row, num_nodes)].set(edge_weight, mode="drop")
    loops = jnp.arange(num_nodes)
    rows = jnp.concatenate([row, loops])
    cols = jnp.concatenate([col, loops])
    ws = jnp.concatenate([w_edges, loop_w])
    deg = jnp.zeros((num_nodes,), jnp.float32).at[rows].add(ws)
    dinv = jnp.where(deg > 0, deg ** -0.5, 0.0)
    norm = dinv[rows] * ws * dinv[cols]
    return rows, cols, norm


def _reference_forward(params, x, edge_index, edge_weight=None, concat_output=True):
    n = x.shape[0]
    rows, cols, norm = _edge_list_norm(edge_index, n, edge_weight)
    collected = [x] if concat_output else None
    for (w, b) in params["layers"]:
        xw = x @ w
        msg = norm[:, None] * xw[rows]
        agg = jnp.zeros((n, w.shape[1]), jnp.float32).at[cols].add(msg)
        x = jnp.maximum(agg + b[None, :], 0.0)
        if concat_output:
            collected.append(x)
    return jnp.concatenate(collected, axis=1) if concat_output else x


# ----------------------------------- main -------------------------------------
if __name__ == "__main__":
    key = jax.random.PRNGKey(0)
    k_param, k_x, k_src, k_dst = jax.random.split(key, 4)

    # small synthetic supervertex graph
    num_nodes = 64
    num_edges = 256
    in_channels = 24                       # raw node feature dim (embedding param shape only)
    inter_feat_channels = 32               # setting.inter_feat_channels
    inter_agg_channels_list = [32, 16]     # setting.inter_agg_channels_list
    concat_output = True                   # setting.concat_output

    params = init_gripnet_internal_params(
        k_param, in_channels, inter_feat_channels, inter_agg_channels_list
    )

    # x is the input node feature embedding (output of the internal feature layer,
    # computed in the GripNet class per the module's docstring), shape [N, inter_feat_channels]
    x = jax.random.normal(k_x, (num_nodes, inter_feat_channels), jnp.float32)

    src = jax.random.randint(k_src, (num_edges,), 0, num_nodes)
    dst = jax.random.randint(k_dst, (num_edges,), 0, num_nodes)
    edge_index = jnp.stack([src, dst], axis=0)  # [2, E], COO

    out = gripnet_internal_forward(params, x, edge_index, None, concat_output)
    out = jax.block_until_ready(out)

    expected_out_channels = inter_feat_channels + sum(inter_agg_channels_list)
    assert out.shape == (num_nodes, expected_out_channels), out.shape

    # Fidelity check against the f32 sparse (edge-list) reference that mirrors the PyTorch
    # module's message passing; tolerance accounts for bf16 MXU operands (f32 accumulation).
    ref = _reference_forward(params, x, edge_index, None, concat_output)
    max_abs = float(jnp.max(jnp.abs(out - ref)))
    rel_fro = float(jnp.linalg.norm(out - ref) / (jnp.linalg.norm(ref) + 1e-12))
    assert max_abs < 0.15 and rel_fro < 2e-2, (max_abs, rel_fro)

    print("KERNEL_OK")
</pallas_src>

<mosaic_0001>
module attributes {stable_mosaic.version = 11 : i64} {
  func.func @kernel(%arg0: i32, %arg1: memref<128x128xbf16, #tpu.memory_space<vmem>>, %arg2: memref<128x32xf32, #tpu.memory_space<vmem>>, %arg3: memref<32x32xbf16, #tpu.memory_space<vmem>>, %arg4: memref<1x32xf32, #tpu.memory_space<vmem>>, %arg5: memref<32x16xbf16, #tpu.memory_space<vmem>>, %arg6: memref<1x16xf32, #tpu.memory_space<vmem>>, %arg7: memref<128x128xf32, #tpu.memory_space<vmem>>) attributes {dimension_semantics = [#tpu.dimension_semantics<arbitrary>], iteration_bounds = array<i64: 1>, scalar_prefetch = 0 : i64, scratch_operands = 0 : i64, tpu.core_type = #tpu.core_type<tc>, window_params = [{pipeline_mode = #tpu.pipeline_mode<synchronous>, transform_indices = @transform_0, window_bounds = array<i64: 128, 128>}, {pipeline_mode = #tpu.pipeline_mode<synchronous>, transform_indices = @transform_1, window_bounds = array<i64: 128, 32>}, {pipeline_mode = #tpu.pipeline_mode<synchronous>, transform_indices = @transform_2, window_bounds = array<i64: 32, 32>}, {pipeline_mode = #tpu.pipeline_mode<synchronous>, transform_indices = @transform_3, window_bounds = array<i64: 1, 32>}, {pipeline_mode = #tpu.pipeline_mode<synchronous>, transform_indices = @transform_4, window_bounds = array<i64: 32, 16>}, {pipeline_mode = #tpu.pipeline_mode<synchronous>, transform_indices = @transform_5, window_bounds = array<i64: 1, 16>}, {pipeline_mode = #tpu.pipeline_mode<synchronous>, transform_indices = @transform_6, window_bounds = array<i64: 128, 128>}]} {
    %c0 = arith.constant 0 : index
    %c0_0 = arith.constant 0 : index
    %0 = vector.load %arg1[%c0, %c0_0] : memref<128x128xbf16, #tpu.memory_space<vmem>>, vector<128x128xbf16>
    %c0_1 = arith.constant 0 : index
    %c0_2 = arith.constant 0 : index
    %1 = vector.load %arg2[%c0_1, %c0_2] : memref<128x32xf32, #tpu.memory_space<vmem>>, vector<128x32xf32>
    %c0_3 = arith.constant 0 : index
    %c0_4 = arith.constant 0 : index
    %2 = vector.load %arg3[%c0_3, %c0_4] : memref<32x32xbf16, #tpu.memory_space<vmem>>, vector<32x32xbf16>
    %c0_5 = arith.constant 0 : index
    %c0_6 = arith.constant 0 : index
    %3 = vector.load %arg4[%c0_5, %c0_6] : memref<1x32xf32, #tpu.memory_space<vmem>>, vector<1x32xf32>
    %4 = arith.truncf %1 : vector<128x32xf32> to vector<128x32xbf16>
    %cst = arith.constant dense<0.000000e+00> : vector<128x32xf32>
    %5 = tpu.matmul %4, %2, %cst {dimension_numbers = #tpu.dot_dimension_numbers<[1], [0], [0], [1], [0, 0, 1, 1], [], []>} : vector<128x32xbf16>, vector<32x32xbf16>, vector<128x32xf32> -> vector<128x32xf32>
    %6 = arith.truncf %5 : vector<128x32xf32> to vector<128x32xbf16>
    %cst_7 = arith.constant dense<0.000000e+00> : vector<128x32xf32>
    %7 = tpu.matmul %0, %6, %cst_7 {dimension_numbers = #tpu.dot_dimension_numbers<[1], [0], [0], [1], [0, 0, 1, 1], [], []>} : vector<128x128xbf16>, vector<128x32xbf16>, vector<128x32xf32> -> vector<128x32xf32>
    %8 = vector.broadcast %3 : vector<1x32xf32> to vector<128x32xf32>
    %9 = arith.addf %7, %8 : vector<128x32xf32>
    %cst_8 = arith.constant 0.000000e+00 : f32
    %10 = vector.broadcast %cst_8 : f32 to vector<128x32xf32>
    %11 = arith.maximumf %9, %10 : vector<128x32xf32>
    %c0_9 = arith.constant 0 : index
    %c0_10 = arith.constant 0 : index
    %12 = vector.load %arg5[%c0_9, %c0_10] : memref<32x16xbf16, #tpu.memory_space<vmem>>, vector<32x16xbf16>
    %c0_11 = arith.constant 0 : index
    %c0_12 = arith.constant 0 : index
    %13 = vector.load %arg6[%c0_11, %c0_12] : memref<1x16xf32, #tpu.memory_space<vmem>>, vector<1x16xf32>
    %14 = arith.truncf %11 : vector<128x32xf32> to vector<128x32xbf16>
    %cst_13 = arith.constant dense<0.000000e+00> : vector<128x16xf32>
    %15 = tpu.matmul %14, %12, %cst_13 {dimension_numbers = #tpu.dot_dimension_numbers<[1], [0], [0], [1], [0, 0, 1, 1], [], []>} : vector<128x32xbf16>, vector<32x16xbf16>, vector<128x16xf32> -> vector<128x16xf32>
    %16 = arith.truncf %15 : vector<128x16xf32> to vector<128x16xbf16>
    %cst_14 = arith.constant dense<0.000000e+00> : vector<128x16xf32>
    %17 = tpu.matmul %0, %16, %cst_14 {dimension_numbers = #tpu.dot_dimension_numbers<[1], [0], [0], [1], [0, 0, 1, 1], [], []>} : vector<128x128xbf16>, vector<128x16xbf16>, vector<128x16xf32> -> vector<128x16xf32>
    %18 = vector.broadcast %13 : vector<1x16xf32> to vector<128x16xf32>
    %19 = arith.addf %17, %18 : vector<128x16xf32>
    %cst_15 = arith.constant 0.000000e+00 : f32
    %20 = vector.broadcast %cst_15 : f32 to vector<128x16xf32>
    %21 = arith.maximumf %19, %20 : vector<128x16xf32>
    %cst_16 = arith.constant 0.000000e+00 : f32
    %22 = vector.broadcast %cst_16 : f32 to vector<128x48xf32>
    %23 = tpu.concatenate %1, %11, %21, %22 in 1 : vector<128x32xf32>, vector<128x32xf32>, vector<128x16xf32>, vector<128x48xf32> -> vector<128x128xf32>
    %c0_17 = arith.constant 0 : index
    %c0_18 = arith.constant 0 : index
    %24 = vector.load %arg7[%c0_17, %c0_18] : memref<128x128xf32, #tpu.memory_space<vmem>>, vector<128x128xf32>
    tpu.vector_store %arg7[%c0_17, %c0_18], %23 {strides = array<i32>} : memref<128x128xf32, #tpu.memory_space<vmem>>, vector<128x128xf32>,
    return
  }
  func.func @transform_0(%arg0: i32) -> (i32, i32) {
    %c0_i32 = arith.constant 0 : i32
    %c0_i32_0 = arith.constant 0 : i32
    %c0_i32_1 = arith.constant 0 : i32
    return %c0_i32, %c0_i32_0 : i32, i32
  }
  func.func @transform_1(%arg0: i32) -> (i32, i32) {
    %c0_i32 = arith.constant 0 : i32
    %c0_i32_0 = arith.constant 0 : i32
    %c0_i32_1 = arith.constant 0 : i32
    return %c0_i32, %c0_i32_0 : i32, i32
  }
  func.func @transform_2(%arg0: i32) -> (i32, i32) {
    %c0_i32 = arith.constant 0 : i32
    %c0_i32_0 = arith.constant 0 : i32
    %c0_i32_1 = arith.constant 0 : i32
    return %c0_i32, %c0_i32_0 : i32, i32
  }
  func.func @transform_3(%arg0: i32) -> (i32, i32) {
    %c0_i32 = arith.constant 0 : i32
    %c0_i32_0 = arith.constant 0 : i32
    %c0_i32_1 = arith.constant 0 : i32
    return %c0_i32, %c0_i32_0 : i32, i32
  }
  func.func @transform_4(%arg0: i32) -> (i32, i32) {
    %c0_i32 = arith.constant 0 : i32
    %c0_i32_0 = arith.constant 0 : i32
    %c0_i32_1 = arith.constant 0 : i32
    return %c0_i32, %c0_i32_0 : i32, i32
  }
  func.func @transform_5(%arg0: i32) -> (i32, i32) {
    %c0_i32 = arith.constant 0 : i32
    %c0_i32_0 = arith.constant 0 : i32
    %c0_i32_1 = arith.constant 0 : i32
    return %c0_i32, %c0_i32_0 : i32, i32
  }
  func.func @transform_6(%arg0: i32) -> (i32, i32) {
    %c0_i32 = arith.constant 0 : i32
    %c0_i32_0 = arith.constant 0 : i32
    %c0_i32_1 = arith.constant 0 : i32
    return %c0_i32, %c0_i32_0 : i32, i32
  }
}

</mosaic_0001>

<bundles_post_ra>
// kernel: tpu_custom_call.1
= control target key start
LH: loop header
LB: loop body
LE: loop exit
PB: predicated region body
PF: predicated region fallthrough
CT: control target
= control target key end

     0   :  { %vm82_vm0 = vcmask 261120   ;;  %s1465_s0 = inlined_call_operand.vmem [shape: bf16[128,128], index: 0, kind: input, shape index: {}]   ;;  %s1466_s1 = inlined_call_operand.vmem [shape: f32[128,32], index: 1, kind: input, shape index: {}]   ;;  %s1467_s2 = inlined_call_operand.vmem [shape: bf16[32,32], index: 2, kind: input, shape index: {}]   ;;  %s1468_s3 = inlined_call_operand.vmem [shape: f32[1,32], index: 3, kind: input, shape index: {}]   ;;  %s1469_s4 = inlined_call_operand.vmem [shape: bf16[32,16], index: 4, kind: input, shape index: {}]   ;;  %s1470_s5 = inlined_call_operand.vmem [shape: f32[1,16], index: 5, kind: input, shape index: {}]   ;;  %s1471_s6 = inlined_call_operand.hbm [shape: f32[128,128], index: 6, kind: output, shape index: {}]  }
   0x1   :  { %v1069_v0 = vld [vmem:[%s1467_s2] sm:$0xff]   ;;  %v1070_v1 = vld [vmem:[%s1467_s2 + $0x8] sm:$0xff]   ;;  %v1166_v5 = vld [vmem:[%s1466_s1 + $0x10] sm:$0xff] }
   0x2   :  { %944 = vmatprep.subr.bf16.mxu0 %v1069_v0  ;;  %v1154_v2 = vld [vmem:[%s1466_s1] sm:$0xff]  ;;  %v1159_v3 = vld [vmem:[%s1466_s1 + $0x8] sm:$0xff]  ;;  %v1171_v6 = vld [vmem:[%s1466_s1 + $0x18] sm:$0xff] }
   0x3   :  { %945 = vmatpush3.bf16.msra.mxu0 %v1069_v0  ;;  %v62_v4 = vpack.c.bf16 %v1159_v3, %v1154_v2  ;;  %v1176_v7 = vld [vmem:[%s1466_s1 + $0x20] sm:$0xff]  ;;  %v1181_v8 = vld [vmem:[%s1466_s1 + $0x28] sm:$0xff]  ;;  %v63_v9 = vpack.c.bf16 %v1171_v6, %v1166_v5  ;;  %v1191_v11 = vld [vmem:[%s1466_s1 + $0x30] sm:$0xff] }
   0x4   :  { %946 = vmatprep.subr.bf16.mxu0 %v1070_v1  ;;  %v64_v10 = vpack.c.bf16 %v1181_v8, %v1176_v7  ;;  %v1196_v12 = vld [vmem:[%s1466_s1 + $0x38] sm:$0xff]  ;;  %v1202_v13 = vld [vmem:[%s1466_s1 + $0x40] sm:$0xff]  ;;  %v1207_v14 = vld [vmem:[%s1466_s1 + $0x48] sm:$0xff] }
   0x5   :  { %948 = vmatprep.mubr.msk.bf16.mxu0 %vm82_vm0, %v62_v4  ;;  %v65_v15 = vpack.c.bf16 %v1196_v12, %v1191_v11 }
   0x7   :  { %947 = vmatpush3.bf16.msra.mxu0 %v1070_v1 }
   0xa   :  { %949 = vmatmul.mubr.msk.bf16.vlgmr.msra.gmra.mrb[0].mxu0 %vm82_vm0, %v63_v9 }
   0xb   :  { %952 = vmatprep.mubr.msk.bf16.mxu0 %vm82_vm0, %v64_v10 }
   0xc   :  { %11 = vsyncpa [#allocation3], 0  ;;  %v66_v16 = vpack.c.bf16 %v1207_v14, %v1202_v13  ;;  %v1219_v17 = vld [vmem:[%s1466_s1 + $0x50] sm:$0xff]  ;;  %v1224_v18 = vld [vmem:[%s1466_s1 + $0x58] sm:$0xff]  ;;  %s1106_s28 = smov 64   ;;  %vm796_vm1 = vcmask 523264  }
   0xd   :  { %v1229_v19 = vld [vmem:[%s1466_s1 + $0x60] sm:$0xff]  ;;  %v1234_v20 = vld [vmem:[%s1466_s1 + $0x68] sm:$0xff]  ;;  %v67_v21 = vpack.c.bf16 %v1224_v18, %v1219_v17  ;;  %v1245_v23 = vld [vmem:[%s1466_s1 + $0x70] sm:$0xff]  ;;  %vm813_vm2 = vcmask 654336  }
   0xe   :  { %v68_v22 = vpack.c.bf16 %v1234_v20, %v1229_v19  ;;  %v1250_v24 = vld [vmem:[%s1466_s1 + $0x78] sm:$0xff]  ;;  %v1258_v26 = vld [vmem:[%s1465_s0] sm:$0xff]   ;;  %v1080_v28 = vld [vmem:[%s1469_s4 + $0x8] sm:$0xff]  }
   0xf   :  { %v69_v25 = vpack.c.bf16 %v1250_v24, %v1245_v23  ;;  %980 = vmatprep.mubr.bf16.mxu1 %v1258_v26  ;;  %v1079_v27 = vld [vmem:[%s1469_s4] sm:$0xff]   ;;  %v1270_v53 = vld [vmem:[%s1465_s0 + $0x8] sm:$0xff]   ;;  %v1073_v54 = vld [vmem:[%s1465_s0 + $0x10] sm:$0xff]  }
  0x10   :  { %996 = vmatprep.subr.bf16.mxu0 %v1079_v27  ;;  %v1279_v55 = vld [vmem:[%s1465_s0 + $0x18] sm:$0xff]   ;;  %v1284_v56 = vld [vmem:[%s1465_s0 + $0x20] sm:$0xff]   ;;  %v1291_v57 = vld [vmem:[%s1465_s0 + $0x28] sm:$0xff]  }
  0x11   :  { %997 = vmatpush3.bf16.msra.mxu0 %v1079_v27  ;;  %v1296_v58 = vld [vmem:[%s1465_s0 + $0x30] sm:$0xff]   ;;  %v1303_v59 = vld [vmem:[%s1465_s0 + $0x38] sm:$0xff]   ;;  %v1309_v60 = vld [vmem:[%s1468_s3] ss:$0 sm:$0xff]  ;;  %s1105_s0 = smov 32  }
  0x12   :  { %953 = vmatmul.mubr.msk.bf16.gmra.mrb[4].mxu0 %vm82_vm0, %v65_v15  ;;  %998 = vmatprep.subr.bf16.mxu0 %v1080_v28 }
  0x13   :  { %956 = vmatprep.mubr.msk.bf16.mxu0 %vm82_vm0, %v66_v16 }
  0x15   :  { %999 = vmatpush3.bf16.msra.mxu0 %v1080_v28 }
  0x1a   :  { %957 = vmatmul.mubr.msk.bf16.gmra.mrb[8].mxu0 %vm82_vm0, %v67_v21 }
  0x1b   :  { %960 = vmatprep.mubr.msk.bf16.mxu0 %vm82_vm0, %v68_v22 }
  0x22   :  { %961 = vmatmul.mubr.msk.bf16.gmra.mrb[12].mxu0 %vm82_vm0, %v69_v25 }
  0xdd   :  { %v950_v29 = vpop.f32.mrb[0].mxu0 }
  0xde   :  { %v141_v30 = vpop.f32.mrb[1].mxu0 }
  0xdf   :  { %v951_v31 = vpop.f32.mrb[2].mxu0 }
  0xe0   :  { %v205_v32 = vpack.c.bf16 %v951_v31, %v950_v29  ;;  %v144_v33 = vpop.f32.mrb[3].mxu0 }
  0xe1   :  { %v204_v34 = vpack.c.bf16 %v144_v33, %v141_v30 }
  0xe3   :  { %964 = vmatprep.subr.bf16.mxu1 %v204_v34 }
  0xe4   :  { %965 = vmatpush3.bf16.msra.mxu1 %v204_v34 }
  0xe5   :  { %v954_v35 = vpop.f32.mrb[4].mxu0  ;;  %966 = vmatprep.subr.bf16.mxu1 %v205_v32 }
  0xe6   :  { %v157_v36 = vpop.f32.mrb[5].mxu0 }
  0xe7   :  { %v955_v37 = vpop.f32.mrb[6].mxu0 }
  0xe8   :  { %v207_v38 = vpack.c.bf16 %v955_v37, %v954_v35  ;;  %v160_v39 = vpop.f32.mrb[7].mxu0  ;;  %967 = vmatpush3.bf16.msra.mxu1 %v205_v32 }
  0xe9   :  { %v206_v40 = vpack.c.bf16 %v160_v39, %v157_v36 }
  0xeb   :  { %968 = vmatprep.subr.bf16.mxu1 %v206_v40 }
  0xec   :  { %969 = vmatpush3.bf16.msra.mxu1 %v206_v40 }
  0xed   :  { %v958_v41 = vpop.f32.mrb[8].mxu0  ;;  %970 = vmatprep.subr.bf16.mxu1 %v207_v38 }
  0xee   :  { %v173_v42 = vpop.f32.mrb[9].mxu0 }
  0xef   :  { %v959_v43 = vpop.f32.mrb[10].mxu0 }
  0xf0   :  { %v209_v44 = vpack.c.bf16 %v959_v43, %v958_v41  ;;  %v176_v45 = vpop.f32.mrb[11].mxu0  ;;  %971 = vmatpush3.bf16.msra.mxu1 %v207_v38 }
  0xf1   :  { %v208_v46 = vpack.c.bf16 %v176_v45, %v173_v42 }
  0xf3   :  { %972 = vmatprep.subr.bf16.mxu1 %v208_v46 }
  0xf4   :  { %973 = vmatpush3.bf16.msra.mxu1 %v208_v46 }
  0xf5   :  { %v962_v47 = vpop.f32.mrb[12].mxu0  ;;  %974 = vmatprep.subr.bf16.mxu1 %v209_v44 }
  0xf6   :  { %v189_v48 = vpop.f32.mrb[13].mxu0 }
  0xf7   :  { %v963_v49 = vpop.f32.mrb[14].mxu0 }
  0xf8   :  { %v211_v50 = vpack.c.bf16 %v963_v49, %v962_v47  ;;  %v192_v51 = vpop.f32.mrb[15].mxu0  ;;  %975 = vmatpush3.bf16.msra.mxu1 %v209_v44 }
  0xf9   :  { %v210_v52 = vpack.c.bf16 %v192_v51, %v189_v48 }
  0xfb   :  { %976 = vmatprep.subr.bf16.mxu1 %v210_v52 }
  0xfc   :  { %977 = vmatpush3.bf16.msra.mxu1 %v210_v52 }
  0xfd   :  { %978 = vmatprep.subr.bf16.mxu1 %v211_v50 }
 0x100   :  { %979 = vmatpush3.bf16.msra.mxu1 %v211_v50 }
 0x103   :  { %981 = vmatmul.mubr.bf16.vlgmr.msra.gmra.mrb[0].mxu1 %v1270_v53 }
 0x104   :  { %984 = vmatprep.mubr.bf16.mxu1 %v1073_v54 }
 0x10b   :  { %985 = vmatmul.mubr.bf16.gmra.mrb[4].mxu1 %v1279_v55 }
 0x10c   :  { %988 = vmatprep.mubr.bf16.mxu1 %v1284_v56 }
 0x113   :  { %989 = vmatmul.mubr.bf16.gmra.mrb[8].mxu1 %v1291_v57 }
 0x114   :  { %992 = vmatprep.mubr.bf16.mxu1 %v1296_v58 }
 0x11b   :  { %993 = vmatmul.mubr.bf16.gmra.mrb[12].mxu1 %v1303_v59 }
 0x11c   :  { %1036 = vmatprep.mubr.bf16.mxu1 %v1073_v54 }
 0x1d6   :  { %v982_v61 = vpop.f32.mrb[0].mxu1 }
 0x1d7   :  { %v309_v62 = vadd.f32 %v982_v61, %v1309_v60  ;;  %v300_v63 = vpop.f32.mrb[1].mxu1 }
 0x1d8   :  { %v301_v0 = vadd.f32 %v1309_v60, %v300_v63  ;;  %v983_v1 = vpop.f32.mrb[2].mxu1 }
 0x1d9   :  { %v365_v4 = vmax.f32 %v309_v62, 0.0  ;;  %v312_v9 = vadd.f32 %v983_v1, %v1309_v60  ;;  %v303_v10 = vpop.f32.mrb[3].mxu1 }
 0x1da   :  { %v363_v15 = vmax.f32 %v301_v0, 0.0  ;;  %v304_v16 = vadd.f32 %v1309_v60, %v303_v10 }
 0x1db   :  { %v366_v21 = vmax.f32 %v312_v9, 0.0  ;;  %672 = vrot.lane.b32.xlu1 %v365_v4, %s1105_s0 }
 0x1dc   :  { %v364_v22 = vmax.f32 %v304_v16, 0.0  ;;  %668 = vrot.lane.b32.xlu0 %v363_v15, %s1105_s0 }
 0x1dd   :  { %v385_v25 = vpack.c.bf16 %v366_v21, %v365_v4 }
 0x1de   :  { %v384_v27 = vpack.c.bf16 %v364_v22, %v363_v15  ;;  %v986_v28 = vpop.f32.mrb[4].mxu1 }
 0x1df   :  { %v325_v29 = vadd.f32 %v986_v28, %v1309_v60  ;;  %674 = vrot.lane.b32.xlu1 %v366_v21, %s1105_s0  ;;  %v316_v30 = vpop.f32.mrb[5].mxu1 }
 0x1e0   :  { %v317_v31 = vadd.f32 %v1309_v60, %v316_v30  ;;  %v987_v32 = vpop.f32.mrb[6].mxu1  ;;  %670 = vrot.lane.b32.xlu0 %v364_v22, %s1105_s0  ;;  %1000 = vmatprep.mubr.msk.bf16.mxu0 %vm82_vm0, %v384_v27 }
 0x1e1   :  { %v369_v33 = vmax.f32 %v325_v29, 0.0  ;;  %v328_v34 = vadd.f32 %v987_v32, %v1309_v60  ;;  %v319_v35 = vpop.f32.mrb[7].mxu1  ;;  %1001 = vmatmul.mubr.msk.bf16.vlgmr.msra.gmra.mrb[16].mxu0 %vm82_vm0, %v385_v25 }
 0x1e2   :  { %v320_v36 = vadd.f32 %v1309_v60, %v319_v35  ;;  %v367_v38 = vmax.f32 %v317_v31, 0.0 }
 0x1e3   :  { %v370_v37 = vmax.f32 %v328_v34, 0.0 }
 0x1e4   :  { %v368_v39 = vmax.f32 %v320_v36, 0.0  ;;  %680 = vrot.lane.b32.xlu0 %v369_v33, %s1105_s0 }
 0x1e5   :  { %v387_v40 = vpack.c.bf16 %v370_v37, %v369_v33  ;;  %682 = vrot.lane.b32.xlu1 %v370_v37, %s1105_s0 }
 0x1e6   :  { %v386_v41 = vpack.c.bf16 %v368_v39, %v367_v38  ;;  %v990_v42 = vpop.f32.mrb[8].mxu1 }
 0x1e7   :  { %v341_v43 = vadd.f32 %v990_v42, %v1309_v60  ;;  %v332_v44 = vpop.f32.mrb[9].mxu1 }
 0x1e8   :  { %v333_v45 = vadd.f32 %v1309_v60, %v332_v44  ;;  %v991_v46 = vpop.f32.mrb[10].mxu1  ;;  %676 = vrot.lane.b32.xlu0 %v367_v38, %s1105_s0  ;;  %1004 = vmatprep.mubr.msk.bf16.mxu0 %vm82_vm0, %v386_v41 }
 0x1e9   :  { %v373_v47 = vmax.f32 %v341_v43, 0.0  ;;  %v344_v48 = vadd.f32 %v991_v46, %v1309_v60  ;;  %v335_v49 = vpop.f32.mrb[11].mxu1  ;;  %678 = vrot.lane.b32.xlu1 %v368_v39, %s1105_s0  ;;  %1005 = vmatmul.mubr.msk.bf16.gmra.mrb[20].mxu0 %vm82_vm0, %v387_v40 }
 0x1ea   :  { %v336_v50 = vadd.f32 %v1309_v60, %v335_v49  ;;  %v371_v52 = vmax.f32 %v333_v45, 0.0 }
 0x1eb   :  { %v374_v51 = vmax.f32 %v344_v48, 0.0 }
 0x1ec   :  { %v372_v54 = vmax.f32 %v336_v50, 0.0  ;;  %688 = vrot.lane.b32.xlu0 %v373_v47, %s1105_s0 }
 0x1ed   :  { %v389_v61 = vpack.c.bf16 %v374_v51, %v373_v47  ;;  %690 = vrot.lane.b32.xlu1 %v374_v51, %s1105_s0 }
 0x1ee   :  { %v388_v62 = vpack.c.bf16 %v372_v54, %v371_v52  ;;  %v994_v63 = vpop.f32.mrb[12].mxu1 }
 0x1ef   :  { %v357_v0 = vadd.f32 %v994_v63, %v1309_v60  ;;  %v348_v1 = vpop.f32.mrb[13].mxu1 }
 0x1f0   :  { %v349_v4 = vadd.f32 %v1309_v60, %v348_v1  ;;  %v995_v9 = vpop.f32.mrb[14].mxu1  ;;  %684 = vrot.lane.b32.xlu0 %v371_v52, %s1105_s0  ;;  %1008 = vmatprep.mubr.msk.bf16.mxu0 %vm82_vm0, %v388_v62  ;;  %v891_v52 = vld [vmem:[%s1470_s5] ss:$0 sm:$0xff]  ;;  %s1107_s5 = smov [#allocation2]  }
 0x1f1   :  { %v377_v10 = vmax.f32 %v357_v0, 0.0  ;;  %v360_v15 = vadd.f32 %v995_v9, %v1309_v60  ;;  %v351_v16 = vpop.f32.mrb[15].mxu1  ;;  %686 = vrot.lane.b32.xlu1 %v372_v54, %s1105_s0  ;;  %1009 = vmatmul.mubr.msk.bf16.gmra.mrb[24].mxu0 %vm82_vm0, %v389_v61  ;;  %s851_s29 = sshll.u32 %s1107_s5, 4  ;;  %s852_s29 = int_to_ptr.vmem [resolvable:$true] %s851_s29 }
 0x1f2   :  { %v352_v21 = vadd.f32 %v1309_v60, %v351_v16  ;;  %v375_v25 = vmax.f32 %v349_v4, 0.0  ;;  %s1081_s30 = scalar_lea.vmem %s852_s29, 2048  ;;  %p1086_p1 = scmp.lt.s32.totalorder %s852_s29, %s852_s29 }
 0x1f3   :  { %v378_v22 = vmax.f32 %v360_v15, 0.0  ;;  %p1082_p0 = scmp.ne.s32.totalorder %s852_s29, %s1081_s30  ;;  %p1087_p2 = scmp.lt.s32.totalorder %s1081_s30, %s1081_s30 }
 0x1f4   :  { %v376_v27 = vmax.f32 %v352_v21, 0.0  ;;  %696 = vrot.lane.b32.xlu0 %v377_v10, %s1105_s0 }
 0x1f5   :  { %v391_v28 = vpack.c.bf16 %v378_v22, %v377_v10  ;;  %698 = vrot.lane.b32.xlu1 %v378_v22, %s1105_s0  ;;  %p1088_p3 = por %p1087_p2, %p1086_p1 }
 0x1f6   :  { %v390_v29 = vpack.c.bf16 %v376_v27, %v375_v25 }
 0x1f7   :  { %p1089_p4 = pnand %p1088_p3, %p1082_p0 }
 0x1f8   :  { %692 = vrot.lane.b32.xlu0 %v375_v25, %s1105_s0  ;;  %1012 = vmatprep.mubr.msk.bf16.mxu0 %vm82_vm0, %v390_v29 }
 0x1f9   :  { %694 = vrot.lane.b32.xlu1 %v376_v27, %s1105_s0  ;;  %1013 = vmatmul.mubr.msk.bf16.gmra.mrb[28].mxu0 %vm82_vm0, %v391_v28 }
 0x1fa   :  { %1032 = vmatprep.mubr.bf16.mxu0 %v1258_v26 }
 0x2b4   :  { %v1002_v60 = vpop.f32.mrb[16].mxu0 }
 0x2b5   :  { %v462_v30 = vpop.f32.mrb[17].mxu0 }
 0x2b6   :  { %v1003_v31 = vpop.f32.mrb[18].mxu0 }
 0x2b7   :  { %v526_v32 = vpack.c.bf16 %v1003_v31, %v1002_v60  ;;  %v465_v33 = vpop.f32.mrb[19].mxu0 }
 0x2b8   :  { %v525_v34 = vpack.c.bf16 %v465_v33, %v462_v30 }
 0x2ba   :  { %1016 = vmatprep.subr.bf16.mxu0 %v525_v34  ;;  %1048 = vmatprep.subr.bf16.mxu1 %v525_v34 }
 0x2bb   :  { %1017 = vmatpush3.bf16.msra.mxu0 %v525_v34  ;;  %1056 = vmatpush3.bf16.msra.mxu1 %v525_v34 }
 0x2bc   :  { %v1006_v35 = vpop.f32.mrb[20].mxu0  ;;  %1018 = vmatprep.subr.bf16.mxu0 %v526_v32  ;;  %1049 = vmatprep.subr.bf16.mxu1 %v526_v32 }
 0x2bd   :  { %v478_v36 = vpop.f32.mrb[21].mxu0 }
 0x2be   :  { %v1007_v37 = vpop.f32.mrb[22].mxu0 }
 0x2bf   :  { %v528_v38 = vpack.c.bf16 %v1007_v37, %v1006_v35  ;;  %v481_v39 = vpop.f32.mrb[23].mxu0  ;;  %1019 = vmatpush3.bf16.msra.mxu0 %v526_v32  ;;  %1057 = vmatpush3.bf16.msra.mxu1 %v526_v32 }
 0x2c0   :  { %v527_v26 = vpack.c.bf16 %v481_v39, %v478_v36 }
 0x2c2   :  { %1020 = vmatprep.subr.bf16.mxu0 %v527_v26  ;;  %1050 = vmatprep.subr.bf16.mxu1 %v527_v26 }
 0x2c3   :  { %1021 = vmatpush3.bf16.msra.mxu0 %v527_v26  ;;  %1058 = vmatpush3.bf16.msra.mxu1 %v527_v26 }
 0x2c4   :  { %v1010_v40 = vpop.f32.mrb[24].mxu0  ;;  %1022 = vmatprep.subr.bf16.mxu0 %v528_v38  ;;  %1051 = vmatprep.subr.bf16.mxu1 %v528_v38 }
 0x2c5   :  { %v494_v41 = vpop.f32.mrb[25].mxu0 }
 0x2c6   :  { %v1011_v42 = vpop.f32.mrb[26].mxu0 }
 0x2c7   :  { %v530_v43 = vpack.c.bf16 %v1011_v42, %v1010_v40  ;;  %v497_v44 = vpop.f32.mrb[27].mxu0  ;;  %1023 = vmatpush3.bf16.msra.mxu0 %v528_v38  ;;  %1059 = vmatpush3.bf16.msra.mxu1 %v528_v38 }
 0x2c8   :  { %v529_v45 = vpack.c.bf16 %v497_v44, %v494_v41 }
 0x2ca   :  { %1024 = vmatprep.subr.bf16.mxu0 %v529_v45  ;;  %1052 = vmatprep.subr.bf16.mxu1 %v529_v45 }
 0x2cb   :  { %1025 = vmatpush3.bf16.msra.mxu0 %v529_v45  ;;  %1060 = vmatpush3.bf16.msra.mxu1 %v529_v45 }
 0x2cc   :  { %v1014_v46 = vpop.f32.mrb[28].mxu0  ;;  %1026 = vmatprep.subr.bf16.mxu0 %v530_v43  ;;  %1053 = vmatprep.subr.bf16.mxu1 %v530_v43 }
 0x2cd   :  { %v510_v47 = vpop.f32.mrb[29].mxu0 }
 0x2ce   :  { %v1015_v48 = vpop.f32.mrb[30].mxu0 }
 0x2cf   :  { %v532_v49 = vpack.c.bf16 %v1015_v48, %v1014_v46  ;;  %v513_v50 = vpop.f32.mrb[31].mxu0  ;;  %1027 = vmatpush3.bf16.msra.mxu0 %v530_v43  ;;  %1061 = vmatpush3.bf16.msra.mxu1 %v530_v43 }
 0x2d0   :  { %v531_v51 = vpack.c.bf16 %v513_v50, %v510_v47 }
 0x2d2   :  { %1028 = vmatprep.subr.bf16.mxu0 %v531_v51  ;;  %1054 = vmatprep.subr.bf16.mxu1 %v531_v51 }
 0x2d3   :  { %1029 = vmatpush3.bf16.msra.mxu0 %v531_v51  ;;  %1062 = vmatpush3.bf16.msra.mxu1 %v531_v51 }
 0x2d4   :  { %1030 = vmatprep.subr.bf16.mxu0 %v532_v49  ;;  %1055 = vmatprep.subr.bf16.mxu1 %v532_v49 }
 0x2d7   :  { %1031 = vmatpush3.bf16.msra.mxu0 %v532_v49  ;;  %1063 = vmatpush3.bf16.msra.mxu1 %v532_v49 }
 0x2da   :  { %1033 = vmatmul.mubr.bf16.vlgmr.msra.gmra.mrb[32].mxu0 %v1270_v53  ;;  %1037 = vmatmul.mubr.bf16.vlgmr.msra.gmra.mrb[16].mxu1 %v1279_v55 }
 0x2db   :  { %1040 = vmatprep.mubr.bf16.mxu1 %v1284_v56 }
 0x2e2   :  { %1041 = vmatmul.mubr.bf16.gmra.mrb[20].mxu1 %v1291_v57 }
 0x2e3   :  { %1044 = vmatprep.mubr.bf16.mxu1 %v1296_v58 }
 0x2ea   :  { %1045 = vmatmul.mubr.bf16.gmra.mrb[24].mxu1 %v1303_v59 }
 0x3ad   :  { %v1034_v54 = vpop.f32.mrb[32].mxu0  ;;  %v1038_v61 = vpop.f32.mrb[16].mxu1 }
 0x3ae   :  { %v582_v62 = vadd.f32 %v1034_v54, %v891_v52  ;;  %v573_v63 = vpop.f32.mrb[33].mxu0  ;;  %v598_v0 = vadd.f32 %v1038_v61, %v891_v52  ;;  %v589_v53 = vpop.f32.mrb[17].mxu1 }
 0x3af   :  { %v1035_v1 = vpop.f32.mrb[34].mxu0  ;;  %v1039_v55 = vpop.f32.mrb[18].mxu1  ;;  %v574_v59 = vadd.f32 %v891_v52, %v573_v63  ;;  %v590_v29 = vadd.f32 %v891_v52, %v589_v53 }
 0x3b0   :  { %v638_v4 = vmax.f32 %v582_v62, 0.0  ;;  %v585_v56 = vadd.f32 %v1035_v1, %v891_v52  ;;  %v576_v9 = vpop.f32.mrb[35].mxu0  ;;  %v592_v57 = vpop.f32.mrb[19].mxu1  ;;  %v642_v58 = vmax.f32 %v598_v0, 0.0  ;;  %v601_v15 = vadd.f32 %v1039_v55, %v891_v52 }
 0x3b1   :  { %v577_v21 = vadd.f32 %v891_v52, %v576_v9  ;;  %v636_v28 = vmax.f32 %v574_v59, 0.0  ;;  %v593_v31 = vadd.f32 %v891_v52, %v592_v57  ;;  %v640_v33 = vmax.f32 %v590_v29, 0.0  ;;  %v669_v61 = vpop.permute.xlu0 %668  ;;  %v673_v62 = vpop.permute.xlu1 %672 }
 0x3b2   :  { %v639_v10 = vmax.f32 %v585_v56, 0.0  ;;  %736 = vrot.lane.b32.xlu0 %v638_v4, %s1106_s28  ;;  %v643_v22 = vmax.f32 %v601_v15, 0.0 }
 0x3b3   :  { %v637_v30 = vmax.f32 %v577_v21, 0.0  ;;  %v641_v35 = vmax.f32 %v593_v31, 0.0 }
 0x3b4   :  { %738 = vrot.lane.b32.xlu1 %v639_v10, %s1106_s28 }
 0x3b5   :  { %v1042_v16 = vpop.f32.mrb[20].mxu1  ;;  %v671_v63 = vpop.permute.xlu0 %670 }
 0x3b6   :  { %744 = vrot.lane.b32.xlu0 %v642_v58, %s1106_s28  ;;  %v605_v25 = vpop.f32.mrb[21].mxu1  ;;  %v614_v32 = vadd.f32 %v1042_v16, %v891_v52  ;;  %v675_v0 = vpop.permute.xlu1 %674  ;;  %v782_v16 = vsel %vm82_vm0, %v1166_v5, %v673_v62 }
 0x3b7   :  { %v1043_v27 = vpop.f32.mrb[22].mxu1  ;;  %v606_v26 = vadd.f32 %v891_v52, %v605_v25  ;;  %v783_v25 = vsel %vm82_vm0, %v1171_v6, %v675_v0 }
 0x3b8   :  { %746 = vrot.lane.b32.xlu1 %v643_v22, %s1106_s28  ;;  %v608_v60 = vpop.f32.mrb[23].mxu1  ;;  %v646_v36 = vmax.f32 %v614_v32, 0.0  ;;  %v617_v37 = vadd.f32 %v1043_v27, %v891_v52 }
 0x3b9   :  { %v609_v42 = vadd.f32 %v891_v52, %v608_v60  ;;  %v644_v44 = vmax.f32 %v606_v26, 0.0  ;;  %v681_v53 = vpop.permute.xlu0 %680 }
 0x3ba   :  { %732 = vrot.lane.b32.xlu0 %v636_v28, %s1106_s28  ;;  %v647_v41 = vmax.f32 %v617_v37, 0.0  ;;  %v683_v1 = vpop.permute.xlu1 %682  ;;  %v786_v60 = vsel %vm82_vm0, %v1191_v11, %v681_v53 }
 0x3bb   :  { %v645_v45 = vmax.f32 %v609_v42, 0.0  ;;  %v787_v32 = vsel %vm82_vm0, %v1196_v12, %v683_v1 }
 0x3bc   :  { %734 = vrot.lane.b32.xlu1 %v637_v30, %s1106_s28 }
 0x3bd   :  { %v1046_v34 = vpop.f32.mrb[24].mxu1  ;;  %v677_v55 = vpop.permute.xlu0 %676 }
 0x3be   :  { %740 = vrot.lane.b32.xlu0 %v640_v33, %s1106_s28  ;;  %v621_v38 = vpop.f32.mrb[25].mxu1  ;;  %v630_v48 = vadd.f32 %v1046_v34, %v891_v52  ;;  %v679_v4 = vpop.permute.xlu1 %678 }
 0x3bf   :  { %v1047_v39 = vpop.f32.mrb[26].mxu1  ;;  %v622_v43 = vadd.f32 %v891_v52, %v621_v38  ;;  %v781_v38 = vsel %vm82_vm0, %v1159_v3, %v671_v63 }
 0x3c0   :  { %742 = vrot.lane.b32.xlu1 %v641_v35, %s1106_s28  ;;  %v624_v40 = vpop.f32.mrb[27].mxu1  ;;  %v633_v49 = vadd.f32 %v1047_v39, %v891_v52  ;;  %v650_v51 = vmax.f32 %v630_v48, 0.0  ;;  %v780_v35 = vsel %vm82_vm0, %v1154_v2, %v669_v61 }
 0x3c1   :  { %v648_v46 = vmax.f32 %v622_v43, 0.0  ;;  %v625_v47 = vadd.f32 %v891_v52, %v624_v40  ;;  %v689_v52 = vpop.permute.xlu0 %688  ;;  %v784_v40 = vsel %vm82_vm0, %v1176_v7, %v677_v55  ;;  %v785_v43 = vsel %vm82_vm0, %v1181_v8, %v679_v4 }
 0x3c2   :  { %752 = vrot.lane.b32.xlu0 %v646_v36, %s1106_s28  ;;  %v651_v54 = vmax.f32 %v633_v49, 0.0  ;;  %v691_v56 = vpop.permute.xlu1 %690 }
 0x3c3   :  { %v649_v50 = vmax.f32 %v625_v47, 0.0  ;;  %v791_v49 = vsel %vm82_vm0, %v1224_v18, %v691_v56 }
 0x3c4   :  { %754 = vrot.lane.b32.xlu1 %v647_v41, %s1106_s28 }
 0x3c5   :  { %v685_v9 = vpop.permute.xlu0 %684 }
 0x3c6   :  { %748 = vrot.lane.b32.xlu0 %v644_v44, %s1106_s28  ;;  %v687_v57 = vpop.permute.xlu1 %686 }
 0x3c7   :  { %v789_v63 = vsel %vm82_vm0, %v1207_v14, %v687_v57 }
 0x3c8   :  { %750 = vrot.lane.b32.xlu1 %v645_v45, %s1106_s28 }
 0x3c9   :  { %v1377_v10 = vpop.permute.xlu0 %696 }
 0x3ca   :  { %756 = vrot.lane.b32.xlu0 %v648_v46, %s1106_s28  ;;  %v1379_v58 = vpop.permute.xlu1 %698  ;;  %v790_v46 = vsel %vm82_vm0, %v1219_v17, %v689_v52 }
 0x3cc   :  { %758 = vrot.lane.b32.xlu1 %v649_v50, %s1106_s28 }
 0x3cd   :  { %v1381_v15 = vpop.permute.xlu0 %692 }
 0x3ce   :  { %760 = vrot.lane.b32.xlu0 %v650_v51, %s1106_s28  ;;  %v1383_v59 = vpop.permute.xlu1 %694  ;;  %v792_v1 = vsel %vm82_vm0, %v1229_v19, %v1381_v15  ;;  %v794_v19 = vsel %vm82_vm0, %v1245_v23, %v1377_v10 }
 0x3cf   :  { %v793_v14 = vsel %vm82_vm0, %v1234_v20, %v1383_v59  ;;  %v795_v20 = vsel %vm82_vm0, %v1250_v24, %v1379_v58 }
 0x3d0   :  { %762 = vrot.lane.b32.xlu1 %v651_v54, %s1106_s28  ;;  %v788_v54 = vsel %vm82_vm0, %v1202_v13, %v685_v9 }
 0x424   :  { %v737_v21 = vpop.permute.xlu0 %736 }
 0x425   :  { %v799_v22 = vsel %vm796_vm1, %v782_v16, %v737_v21 }
 0x426   :  { %v816_v27 = vsel %vm813_vm2, %v799_v22, 0.0  ;;  %v739_v28 = vpop.permute.xlu1 %738 }
 0x427   :  { %832 = vst [vmem:[#allocation2 + $0x10] sm:$0xff] %v816_v27  ;;  %v800_v29 = vsel %vm796_vm1, %v783_v25, %v739_v28 }
 0x428   :  { %v817_v30 = vsel %vm813_vm2, %v800_v29, 0.0  ;;  %v745_v31 = vpop.permute.xlu0 %744 }
 0x429   :  { %833 = vst [vmem:[#allocation2 + $0x18] sm:$0xff] %v817_v30  ;;  %v803_v5 = vsel %vm796_vm1, %v786_v60, %v745_v31 }
 0x42a   :  { %v820_v6 = vsel %vm813_vm2, %v803_v5, 0.0  ;;  %v747_v33 = vpop.permute.xlu1 %746 }
 0x42b   :  { %836 = vst [vmem:[#allocation2 + $0x30] sm:$0xff] %v820_v6  ;;  %v804_v34 = vsel %vm796_vm1, %v787_v32, %v747_v33 }
 0x42c   :  { %v821_v11 = vsel %vm813_vm2, %v804_v34, 0.0  ;;  %v733_v36 = vpop.permute.xlu0 %732 }
 0x42d   :  { %837 = vst [vmem:[#allocation2 + $0x38] sm:$0xff] %v821_v11  ;;  %v797_v37 = vsel %vm796_vm1, %v780_v35, %v733_v36 }
 0x42e   :  { %v814_v12 = vsel %vm813_vm2, %v797_v37, 0.0  ;;  %v735_v39 = vpop.permute.xlu1 %734 }
 0x42f   :  { %830 = vst [vmem:[#allocation2] sm:$0xff] %v814_v12  ;;  %v798_v26 = vsel %vm796_vm1, %v781_v38, %v735_v39 }
 0x430   :  { %v815_v2 = vsel %vm813_vm2, %v798_v26, 0.0  ;;  %v741_v41 = vpop.permute.xlu0 %740 }
 0x431   :  { %831 = vst [vmem:[#allocation2 + $0x8] sm:$0xff] %v815_v2  ;;  %v801_v42 = vsel %vm796_vm1, %v784_v40, %v741_v41 }
 0x432   :  { %v818_v3 = vsel %vm813_vm2, %v801_v42, 0.0  ;;  %v743_v44 = vpop.permute.xlu1 %742 }
 0x433   :  { %834 = vst [vmem:[#allocation2 + $0x20] sm:$0xff] %v818_v3  ;;  %v802_v45 = vsel %vm796_vm1, %v785_v43, %v743_v44 }
 0x434   :  { %v819_v7 = vsel %vm813_vm2, %v802_v45, 0.0  ;;  %v753_v47 = vpop.permute.xlu0 %752 }
 0x435   :  { %835 = vst [vmem:[#allocation2 + $0x28] sm:$0xff] %v819_v7  ;;  %v807_v48 = vsel %vm796_vm1, %v790_v46, %v753_v47 }
 0x436   :  { %v824_v8 = vsel %vm813_vm2, %v807_v48, 0.0  ;;  %v755_v50 = vpop.permute.xlu1 %754 }
 0x437   :  { %840 = vst [vmem:[#allocation2 + $0x50] sm:$0xff] %v824_v8  ;;  %v808_v51 = vsel %vm796_vm1, %v791_v49, %v755_v50 }
 0x438   :  { %v825_v17 = vsel %vm813_vm2, %v808_v51, 0.0  ;;  %v749_v61 = vpop.permute.xlu0 %748 }
 0x439   :  { %841 = vst [vmem:[#allocation2 + $0x58] sm:$0xff] %v825_v17  ;;  %v805_v62 = vsel %vm796_vm1, %v788_v54, %v749_v61 }
 0x43a   :  { %v822_v18 = vsel %vm813_vm2, %v805_v62, 0.0  ;;  %v751_v0 = vpop.permute.xlu1 %750 }
 0x43b   :  { %838 = vst [vmem:[#allocation2 + $0x40] sm:$0xff] %v822_v18  ;;  %v806_v53 = vsel %vm796_vm1, %v789_v63, %v751_v0 }
 0x43c   :  { %v823_v13 = vsel %vm813_vm2, %v806_v53, 0.0  ;;  %v757_v55 = vpop.permute.xlu0 %756 }
 0x43d   :  { %839 = vst [vmem:[#allocation2 + $0x48] sm:$0xff] %v823_v13  ;;  %v809_v4 = vsel %vm796_vm1, %v792_v1, %v757_v55 }
 0x43e   :  { %v826_v52 = vsel %vm813_vm2, %v809_v4, 0.0  ;;  %v759_v56 = vpop.permute.xlu1 %758 }
 0x43f   :  { %842 = vst [vmem:[#allocation2 + $0x60] sm:$0xff] %v826_v52  ;;  %v810_v9 = vsel %vm796_vm1, %v793_v14, %v759_v56 }
 0x440   :  { %v827_v57 = vsel %vm813_vm2, %v810_v9, 0.0  ;;  %v761_v15 = vpop.permute.xlu0 %760 }
 0x441   :  { %843 = vst [vmem:[#allocation2 + $0x68] sm:$0xff] %v827_v57  ;;  %v811_v16 = vsel %vm796_vm1, %v794_v19, %v761_v15 }
 0x442   :  { %v828_v59 = vsel %vm813_vm2, %v811_v16, 0.0  ;;  %v763_v21 = vpop.permute.xlu1 %762 }
 0x443   :  { %844 = vst [vmem:[#allocation2 + $0x70] sm:$0xff] %v828_v59  ;;  %v812_v22 = vsel %vm796_vm1, %v795_v20, %v763_v21 }
 0x444   :  { %v829_v25 = vsel %vm813_vm2, %v812_v22, 0.0 }
 0x445   :  { %845 = vst [vmem:[#allocation2 + $0x78] sm:$0xff] %v829_v25 }
 0x446   :  { %1092 = shalt.err (!%p1089_p4)
}
 0x447   :  { %s1093_s8 = scalar_lea.hbm %s1471_s6, 2048 }
 0x448   :  { %p1094_p5 = scmp.ne.s32.totalorder %s1471_s6, %s1093_s8  ;;  %p1097_p6 = scmp.lt.u32.totalorder %s1093_s8, %s1471_s6 }
 0x44a   :  { %p1099_p7 = pnand %p1097_p6, %p1094_p5 }
 0x44c   :  { %1102 = shalt.err (!%p1099_p7)
}
 0x44d   :  { %s1108_s1 = smov 128   ;;  %s1109_s4 = smov 8  }
 0x44e   :  { %857 = dma.vmem_to_hbm [thread:$0]  %s852_s29, 2048, %s1471_s6, [#allocation3], %s1108_s1, %s1108_s1, %s1109_s4  }
 0x44f   :  { %1103 = dma.done.wait [#allocation3], 2048  }
 0x450   :  { %1104 = vsyncadd [#allocation3], 4294965248 }
 0x451   :  { %861 = vsyncpa [#allocation3], 1 }

</bundles_post_ra>
